<compile_context>
chip_gen: v6e
topology: v6e:2x2x1
jax: 0.10.0
libtpu: 0.0.40
codegen_flags: <defaults>
</compile_context>

<pallas_src>
import functools

import jax
import jax.numpy as jnp
from jax.experimental import pallas as pl
from jax.experimental.pallas import tpu as pltpu


_HIDDEN = (64, 512, 256, 128, 64, 32, 16)
_LANE = 128


def _layer_dims(feature_size: int, num_class: int):
    return [feature_size, *_HIDDEN, num_class]


def _round_up(n: int, m: int) -> int:
    return ((n + m - 1) // m) * m


def _padded_dims(feature_size: int, num_class: int):
    dims = _layer_dims(feature_size, num_class)
    # Input width stays as-is (it's the full x array dim, so the block is legal);
    # every layer-output width is padded to a multiple of 128 lanes.
    return [dims[0]] + [_round_up(d, _LANE) for d in dims[1:]]


def init_params(key, feature_size: int, num_class: int):
    """PyTorch-Linear-style uniform init; weights stored as (in, out) f32."""
    dims = _layer_dims(feature_size, num_class)
    params = []
    for i in range(len(dims) - 1):
        fan_in, fan_out = dims[i], dims[i + 1]
        key, kw, kb = jax.random.split(key, 3)
        bound = 1.0 / jnp.sqrt(jnp.float32(fan_in))
        w = jax.random.uniform(kw, (fan_in, fan_out), jnp.float32, -bound, bound)
        b = jax.random.uniform(kb, (1, fan_out), jnp.float32, -bound, bound)
        params.append(w)
        params.append(b)
    return params


def pack_params(params, feature_size: int, num_class: int):
    """Pad weights to lane-dense shapes (bf16) and pack all biases into one f32 buffer."""
    dims = _layer_dims(feature_size, num_class)
    pdims = _padded_dims(feature_size, num_class)
    n_layers = len(dims) - 1
    rows = _round_up(n_layers, 8)                # sublane-aligned bias buffer
    max_out = max(pdims[1:])
    weights = []
    bias = jnp.zeros((rows, max_out), jnp.float32)
    for i in range(n_layers):
        w = params[2 * i]                        # (in, out) f32
        b = params[2 * i + 1].reshape(-1)        # (out,)   f32
        w_pad = jnp.zeros((pdims[i], pdims[i + 1]), jnp.float32)
        w_pad = w_pad.at[: w.shape[0], : w.shape[1]].set(w)
        weights.append(w_pad.astype(jnp.bfloat16))
        bias = bias.at[i, : b.shape[0]].set(b)
    return tuple(weights), bias


def _make_kernel(out_dims):
    n_layers = len(out_dims)

    def kernel(x_ref, *refs):
        w_refs = refs[:n_layers]
        b_ref = refs[n_layers]
        out_ref = refs[n_layers + 1]

        h = x_ref[...].astype(jnp.float32)       # matches x.to(torch.float32)
        for i in range(n_layers):
            w = w_refs[i][...]                   # bf16 (in_pad, out_pad), MXU input
            b = b_ref[i, : out_dims[i]]          # f32 (out_pad,), static slice
            h = jnp.dot(h.astype(jnp.bfloat16), w,
                        preferred_element_type=jnp.float32) + b
            if i < n_layers - 1:                 # ReLU after every layer except last
                h = jnp.maximum(h, 0.0)
        out_ref[...] = h

    return kernel


@functools.partial(jax.jit, static_argnames=("num_class", "block_batch"))
def nwfnet_forward(x, weights, bias, *, num_class: int, block_batch: int = 256):
    x = x.astype(jnp.float32)
    batch, feature_size = x.shape
    pdims = _padded_dims(feature_size, num_class)
    out_dims = tuple(pdims[1:])
    n_layers = len(out_dims)
    out_pad = pdims[-1]

    # block_batch must be a multiple of 8; if the whole batch fits in one block,
    # use it directly (block == full array dim is always legal).
    bm = batch if batch <= block_batch else block_batch
    grid = (pl.cdiv(batch, bm),)

    in_specs = [pl.BlockSpec((bm, feature_size), lambda i: (i, 0))]
    for w in weights:                            # weights resident across the grid
        in_specs.append(pl.BlockSpec(w.shape, lambda i: (0, 0)))
    in_specs.append(pl.BlockSpec(bias.shape, lambda i: (0, 0)))
    out_specs = pl.BlockSpec((bm, out_pad), lambda i: (i, 0))

    flops = 2 * batch * sum(pdims[i] * pdims[i + 1] for i in range(n_layers))
    bytes_accessed = (sum(w.size * 2 for w in weights) + bias.size * 4
                      + batch * feature_size * 4 + batch * out_pad * 4)

    out_padded = pl.pallas_call(
        _make_kernel(out_dims),
        out_shape=jax.ShapeDtypeStruct((batch, out_pad), jnp.float32),
        grid=grid,
        in_specs=in_specs,
        out_specs=out_specs,
        compiler_params=pltpu.CompilerParams(
            dimension_semantics=("parallel",)),   # v7x: 2 TCs split the batch grid
        cost_estimate=pl.CostEstimate(
            flops=flops, transcendentals=0, bytes_accessed=bytes_accessed),
    )(x, *weights, bias)

    return out_padded[:, :num_class]


def _reference_forward(x, params):
    """Pure-JAX reference using the same bf16-weight / f32-accumulate recipe."""
    h = x.astype(jnp.float32)
    n_layers = len(params) // 2
    for i in range(n_layers):
        w = params[2 * i].astype(jnp.bfloat16)
        b = params[2 * i + 1]
        h = jnp.dot(h.astype(jnp.bfloat16), w,
                    preferred_element_type=jnp.float32) + b
        if i < n_layers - 1:
            h = jnp.maximum(h, 0.0)
    return h


if __name__ == "__main__":
    feature_size = 32
    num_class = 4
    batch = 64

    key = jax.random.PRNGKey(0)
    key, kx = jax.random.split(key)
    x = jax.random.normal(kx, (batch, feature_size), dtype=jnp.float32)

    params = init_params(key, feature_size, num_class)
    weights, bias = pack_params(params, feature_size, num_class)

    # block_batch=32 -> grid=(2,) so the batch pipeline actually exercises >1 step.
    out = nwfnet_forward(x, weights, bias, num_class=num_class, block_batch=32)
    out = jax.block_until_ready(out)

    ref = _reference_forward(x, params)
    assert out.shape == (batch, num_class)
    assert jnp.allclose(out, ref, atol=1e-3, rtol=1e-3), "mismatch vs reference"

    print("KERNEL_OK")
</pallas_src>

<mosaic_0001>
module attributes {stable_mosaic.version = 11 : i64} {
  func.func @kernel(%arg0: i32, %arg1: memref<32x32xf32, #tpu.memory_space<vmem>>, %arg2: memref<32x128xbf16, #tpu.memory_space<vmem>>, %arg3: memref<128x512xbf16, #tpu.memory_space<vmem>>, %arg4: memref<512x256xbf16, #tpu.memory_space<vmem>>, %arg5: memref<256x128xbf16, #tpu.memory_space<vmem>>, %arg6: memref<128x128xbf16, #tpu.memory_space<vmem>>, %arg7: memref<128x128xbf16, #tpu.memory_space<vmem>>, %arg8: memref<128x128xbf16, #tpu.memory_space<vmem>>, %arg9: memref<128x128xbf16, #tpu.memory_space<vmem>>, %arg10: memref<8x512xf32, #tpu.memory_space<vmem>>, %arg11: memref<32x128xf32, #tpu.memory_space<vmem>>) attributes {dimension_semantics = [#tpu.dimension_semantics<parallel>], iteration_bounds = array<i64: 2>, scalar_prefetch = 0 : i64, scratch_operands = 0 : i64, tpu.core_type = #tpu.core_type<tc>, window_params = [{transform_indices = @transform_0, window_bounds = array<i64: 32, 32>}, {pipeline_mode = #tpu.pipeline_mode<synchronous>, transform_indices = @transform_1, window_bounds = array<i64: 32, 128>}, {pipeline_mode = #tpu.pipeline_mode<synchronous>, transform_indices = @transform_2, window_bounds = array<i64: 128, 512>}, {pipeline_mode = #tpu.pipeline_mode<synchronous>, transform_indices = @transform_3, window_bounds = array<i64: 512, 256>}, {pipeline_mode = #tpu.pipeline_mode<synchronous>, transform_indices = @transform_4, window_bounds = array<i64: 256, 128>}, {pipeline_mode = #tpu.pipeline_mode<synchronous>, transform_indices = @transform_5, window_bounds = array<i64: 128, 128>}, {pipeline_mode = #tpu.pipeline_mode<synchronous>, transform_indices = @transform_6, window_bounds = array<i64: 128, 128>}, {pipeline_mode = #tpu.pipeline_mode<synchronous>, transform_indices = @transform_7, window_bounds = array<i64: 128, 128>}, {pipeline_mode = #tpu.pipeline_mode<synchronous>, transform_indices = @transform_8, window_bounds = array<i64: 128, 128>}, {pipeline_mode = #tpu.pipeline_mode<synchronous>, transform_indices = @transform_9, window_bounds = array<i64: 8, 512>}, {transform_indices = @transform_10, window_bounds = array<i64: 32, 128>}]} {
    %c0 = arith.constant 0 : index
    %c0_0 = arith.constant 0 : index
    %0 = vector.load %arg1[%c0, %c0_0] : memref<32x32xf32, #tpu.memory_space<vmem>>, vector<32x32xf32>
    %c0_1 = arith.constant 0 : index
    %c0_2 = arith.constant 0 : index
    %1 = vector.load %arg2[%c0_1, %c0_2] : memref<32x128xbf16, #tpu.memory_space<vmem>>, vector<32x128xbf16>
    %c0_3 = arith.constant 0 : index
    %c0_4 = arith.constant 0 : index
    %2 = vector.load %arg10[%c0_3, %c0_4] : memref<8x512xf32, #tpu.memory_space<vmem>>, vector<1x128xf32>
    %3 = vector.shape_cast %2 : vector<1x128xf32> to vector<128xf32>
    %4 = arith.truncf %0 : vector<32x32xf32> to vector<32x32xbf16>
    %cst = arith.constant dense<0.000000e+00> : vector<32x128xf32>
    %5 = tpu.matmul %4, %1, %cst {dimension_numbers = #tpu.dot_dimension_numbers<[1], [0], [0], [1], [0, 0, 1, 1], [], []>} : vector<32x32xbf16>, vector<32x128xbf16>, vector<32x128xf32> -> vector<32x128xf32>
    %6 = vector.shape_cast %3 : vector<128xf32> to vector<1x128xf32>
    %7 = vector.broadcast %6 : vector<1x128xf32> to vector<32x128xf32>
    %8 = arith.addf %5, %7 : vector<32x128xf32>
    %cst_5 = arith.constant 0.000000e+00 : f32
    %9 = vector.broadcast %cst_5 : f32 to vector<32x128xf32>
    %10 = arith.maximumf %8, %9 : vector<32x128xf32>
    %c0_6 = arith.constant 0 : index
    %c0_7 = arith.constant 0 : index
    %11 = vector.load %arg3[%c0_6, %c0_7] : memref<128x512xbf16, #tpu.memory_space<vmem>>, vector<128x512xbf16>
    %c1 = arith.constant 1 : index
    %c0_8 = arith.constant 0 : index
    %12 = vector.load %arg10[%c1, %c0_8] : memref<8x512xf32, #tpu.memory_space<vmem>>, vector<1x512xf32>
    %13 = vector.shape_cast %12 : vector<1x512xf32> to vector<512xf32>
    %14 = arith.truncf %10 : vector<32x128xf32> to vector<32x128xbf16>
    %cst_9 = arith.constant dense<0.000000e+00> : vector<32x512xf32>
    %15 = tpu.matmul %14, %11, %cst_9 {dimension_numbers = #tpu.dot_dimension_numbers<[1], [0], [0], [1], [0, 0, 1, 1], [], []>} : vector<32x128xbf16>, vector<128x512xbf16>, vector<32x512xf32> -> vector<32x512xf32>
    %16 = vector.shape_cast %13 : vector<512xf32> to vector<1x512xf32>
    %17 = vector.broadcast %16 : vector<1x512xf32> to vector<32x512xf32>
    %18 = arith.addf %15, %17 : vector<32x512xf32>
    %cst_10 = arith.constant 0.000000e+00 : f32
    %19 = vector.broadcast %cst_10 : f32 to vector<32x512xf32>
    %20 = arith.maximumf %18, %19 : vector<32x512xf32>
    %c0_11 = arith.constant 0 : index
    %c0_12 = arith.constant 0 : index
    %21 = vector.load %arg4[%c0_11, %c0_12] : memref<512x256xbf16, #tpu.memory_space<vmem>>, vector<512x256xbf16>
    %c2 = arith.constant 2 : index
    %c0_13 = arith.constant 0 : index
    %22 = vector.load %arg10[%c2, %c0_13] : memref<8x512xf32, #tpu.memory_space<vmem>>, vector<1x256xf32>
    %23 = vector.shape_cast %22 : vector<1x256xf32> to vector<256xf32>
    %24 = arith.truncf %20 : vector<32x512xf32> to vector<32x512xbf16>
    %cst_14 = arith.constant dense<0.000000e+00> : vector<32x256xf32>
    %25 = tpu.matmul %24, %21, %cst_14 {dimension_numbers = #tpu.dot_dimension_numbers<[1], [0], [0], [1], [0, 0, 1, 1], [], []>} : vector<32x512xbf16>, vector<512x256xbf16>, vector<32x256xf32> -> vector<32x256xf32>
    %26 = vector.shape_cast %23 : vector<256xf32> to vector<1x256xf32>
    %27 = vector.broadcast %26 : vector<1x256xf32> to vector<32x256xf32>
    %28 = arith.addf %25, %27 : vector<32x256xf32>
    %cst_15 = arith.constant 0.000000e+00 : f32
    %29 = vector.broadcast %cst_15 : f32 to vector<32x256xf32>
    %30 = arith.maximumf %28, %29 : vector<32x256xf32>
    %c0_16 = arith.constant 0 : index
    %c0_17 = arith.constant 0 : index
    %31 = vector.load %arg5[%c0_16, %c0_17] : memref<256x128xbf16, #tpu.memory_space<vmem>>, vector<256x128xbf16>
    %c3 = arith.constant 3 : index
    %c0_18 = arith.constant 0 : index
    %32 = vector.load %arg10[%c3, %c0_18] : memref<8x512xf32, #tpu.memory_space<vmem>>, vector<1x128xf32>
    %33 = vector.shape_cast %32 : vector<1x128xf32> to vector<128xf32>
    %34 = arith.truncf %30 : vector<32x256xf32> to vector<32x256xbf16>
    %cst_19 = arith.constant dense<0.000000e+00> : vector<32x128xf32>
    %35 = tpu.matmul %34, %31, %cst_19 {dimension_numbers = #tpu.dot_dimension_numbers<[1], [0], [0], [1], [0, 0, 1, 1], [], []>} : vector<32x256xbf16>, vector<256x128xbf16>, vector<32x128xf32> -> vector<32x128xf32>
    %36 = vector.shape_cast %33 : vector<128xf32> to vector<1x128xf32>
    %37 = vector.broadcast %36 : vector<1x128xf32> to vector<32x128xf32>
    %38 = arith.addf %35, %37 : vector<32x128xf32>
    %cst_20 = arith.constant 0.000000e+00 : f32
    %39 = vector.broadcast %cst_20 : f32 to vector<32x128xf32>
    %40 = arith.maximumf %38, %39 : vector<32x128xf32>
    %c0_21 = arith.constant 0 : index
    %c0_22 = arith.constant 0 : index
    %41 = vector.load %arg6[%c0_21, %c0_22] : memref<128x128xbf16, #tpu.memory_space<vmem>>, vector<128x128xbf16>
    %c4 = arith.constant 4 : index
    %c0_23 = arith.constant 0 : index
    %42 = vector.load %arg10[%c4, %c0_23] : memref<8x512xf32, #tpu.memory_space<vmem>>, vector<1x128xf32>
    %43 = vector.shape_cast %42 : vector<1x128xf32> to vector<128xf32>
    %44 = arith.truncf %40 : vector<32x128xf32> to vector<32x128xbf16>
    %cst_24 = arith.constant dense<0.000000e+00> : vector<32x128xf32>
    %45 = tpu.matmul %44, %41, %cst_24 {dimension_numbers = #tpu.dot_dimension_numbers<[1], [0], [0], [1], [0, 0, 1, 1], [], []>} : vector<32x128xbf16>, vector<128x128xbf16>, vector<32x128xf32> -> vector<32x128xf32>
    %46 = vector.shape_cast %43 : vector<128xf32> to vector<1x128xf32>
    %47 = vector.broadcast %46 : vector<1x128xf32> to vector<32x128xf32>
    %48 = arith.addf %45, %47 : vector<32x128xf32>
    %cst_25 = arith.constant 0.000000e+00 : f32
    %49 = vector.broadcast %cst_25 : f32 to vector<32x128xf32>
    %50 = arith.maximumf %48, %49 : vector<32x128xf32>
    %c0_26 = arith.constant 0 : index
    %c0_27 = arith.constant 0 : index
    %51 = vector.load %arg7[%c0_26, %c0_27] : memref<128x128xbf16, #tpu.memory_space<vmem>>, vector<128x128xbf16>
    %c5 = arith.constant 5 : index
    %c0_28 = arith.constant 0 : index
    %52 = vector.load %arg10[%c5, %c0_28] : memref<8x512xf32, #tpu.memory_space<vmem>>, vector<1x128xf32>
    %53 = vector.shape_cast %52 : vector<1x128xf32> to vector<128xf32>
    %54 = arith.truncf %50 : vector<32x128xf32> to vector<32x128xbf16>
    %cst_29 = arith.constant dense<0.000000e+00> : vector<32x128xf32>
    %55 = tpu.matmul %54, %51, %cst_29 {dimension_numbers = #tpu.dot_dimension_numbers<[1], [0], [0], [1], [0, 0, 1, 1], [], []>} : vector<32x128xbf16>, vector<128x128xbf16>, vector<32x128xf32> -> vector<32x128xf32>
    %56 = vector.shape_cast %53 : vector<128xf32> to vector<1x128xf32>
    %57 = vector.broadcast %56 : vector<1x128xf32> to vector<32x128xf32>
    %58 = arith.addf %55, %57 : vector<32x128xf32>
    %cst_30 = arith.constant 0.000000e+00 : f32
    %59 = vector.broadcast %cst_30 : f32 to vector<32x128xf32>
    %60 = arith.maximumf %58, %59 : vector<32x128xf32>
    %c0_31 = arith.constant 0 : index
    %c0_32 = arith.constant 0 : index
    %61 = vector.load %arg8[%c0_31, %c0_32] : memref<128x128xbf16, #tpu.memory_space<vmem>>, vector<128x128xbf16>
    %c6 = arith.constant 6 : index
    %c0_33 = arith.constant 0 : index
    %62 = vector.load %arg10[%c6, %c0_33] : memref<8x512xf32, #tpu.memory_space<vmem>>, vector<1x128xf32>
    %63 = vector.shape_cast %62 : vector<1x128xf32> to vector<128xf32>
    %64 = arith.truncf %60 : vector<32x128xf32> to vector<32x128xbf16>
    %cst_34 = arith.constant dense<0.000000e+00> : vector<32x128xf32>
    %65 = tpu.matmul %64, %61, %cst_34 {dimension_numbers = #tpu.dot_dimension_numbers<[1], [0], [0], [1], [0, 0, 1, 1], [], []>} : vector<32x128xbf16>, vector<128x128xbf16>, vector<32x128xf32> -> vector<32x128xf32>
    %66 = vector.shape_cast %63 : vector<128xf32> to vector<1x128xf32>
    %67 = vector.broadcast %66 : vector<1x128xf32> to vector<32x128xf32>
    %68 = arith.addf %65, %67 : vector<32x128xf32>
    %cst_35 = arith.constant 0.000000e+00 : f32
    %69 = vector.broadcast %cst_35 : f32 to vector<32x128xf32>
    %70 = arith.maximumf %68, %69 : vector<32x128xf32>
    %c0_36 = arith.constant 0 : index
    %c0_37 = arith.constant 0 : index
    %71 = vector.load %arg9[%c0_36, %c0_37] : memref<128x128xbf16, #tpu.memory_space<vmem>>, vector<128x128xbf16>
    %c7 = arith.constant 7 : index
    %c0_38 = arith.constant 0 : index
    %72 = vector.load %arg10[%c7, %c0_38] : memref<8x512xf32, #tpu.memory_space<vmem>>, vector<1x128xf32>
    %73 = vector.shape_cast %72 : vector<1x128xf32> to vector<128xf32>
    %74 = arith.truncf %70 : vector<32x128xf32> to vector<32x128xbf16>
    %cst_39 = arith.constant dense<0.000000e+00> : vector<32x128xf32>
    %75 = tpu.matmul %74, %71, %cst_39 {dimension_numbers = #tpu.dot_dimension_numbers<[1], [0], [0], [1], [0, 0, 1, 1], [], []>} : vector<32x128xbf16>, vector<128x128xbf16>, vector<32x128xf32> -> vector<32x128xf32>
    %76 = vector.shape_cast %73 : vector<128xf32> to vector<1x128xf32>
    %77 = vector.broadcast %76 : vector<1x128xf32> to vector<32x128xf32>
    %78 = arith.addf %75, %77 : vector<32x128xf32>
    %c0_40 = arith.constant 0 : index
    %c0_41 = arith.constant 0 : index
    %79 = vector.load %arg11[%c0_40, %c0_41] : memref<32x128xf32, #tpu.memory_space<vmem>>, vector<32x128xf32>
    tpu.vector_store %arg11[%c0_40, %c0_41], %78 {strides = array<i32>} : memref<32x128xf32, #tpu.memory_space<vmem>>, vector<32x128xf32>,
    return
  }
  func.func @transform_0(%arg0: i32) -> (i32, i32) {
    %c0_i32 = arith.constant 0 : i32
    %c0_i32_0 = arith.constant 0 : i32
    return %arg0, %c0_i32 : i32, i32
  }
  func.func @transform_1(%arg0: i32) -> (i32, i32) {
    %c0_i32 = arith.constant 0 : i32
    %c0_i32_0 = arith.constant 0 : i32
    %c0_i32_1 = arith.constant 0 : i32
    return %c0_i32, %c0_i32_0 : i32, i32
  }
  func.func @transform_2(%arg0: i32) -> (i32, i32) {
    %c0_i32 = arith.constant 0 : i32
    %c0_i32_0 = arith.constant 0 : i32
    %c0_i32_1 = arith.constant 0 : i32
    return %c0_i32, %c0_i32_0 : i32, i32
  }
  func.func @transform_3(%arg0: i32) -> (i32, i32) {
    %c0_i32 = arith.constant 0 : i32
    %c0_i32_0 = arith.constant 0 : i32
    %c0_i32_1 = arith.constant 0 : i32
    return %c0_i32, %c0_i32_0 : i32, i32
  }
  func.func @transform_4(%arg0: i32) -> (i32, i32) {
    %c0_i32 = arith.constant 0 : i32
    %c0_i32_0 = arith.constant 0 : i32
    %c0_i32_1 = arith.constant 0 : i32
    return %c0_i32, %c0_i32_0 : i32, i32
  }
  func.func @transform_5(%arg0: i32) -> (i32, i32) {
    %c0_i32 = arith.constant 0 : i32
    %c0_i32_0 = arith.constant 0 : i32
    %c0_i32_1 = arith.constant 0 : i32
    return %c0_i32, %c0_i32_0 : i32, i32
  }
  func.func @transform_6(%arg0: i32) -> (i32, i32) {
    %c0_i32 = arith.constant 0 : i32
    %c0_i32_0 = arith.constant 0 : i32
    %c0_i32_1 = arith.constant 0 : i32
    return %c0_i32, %c0_i32_0 : i32, i32
  }
  func.func @transform_7(%arg0: i32) -> (i32, i32) {
    %c0_i32 = arith.constant 0 : i32
    %c0_i32_0 = arith.constant 0 : i32
    %c0_i32_1 = arith.constant 0 : i32
    return %c0_i32, %c0_i32_0 : i32, i32
  }
  func.func @transform_8(%arg0: i32) -> (i32, i32) {
    %c0_i32 = arith.constant 0 : i32
    %c0_i32_0 = arith.constant 0 : i32
    %c0_i32_1 = arith.constant 0 : i32
    return %c0_i32, %c0_i32_0 : i32, i32
  }
  func.func @transform_9(%arg0: i32) -> (i32, i32) {
    %c0_i32 = arith.constant 0 : i32
    %c0_i32_0 = arith.constant 0 : i32
    %c0_i32_1 = arith.constant 0 : i32
    return %c0_i32, %c0_i32_0 : i32, i32
  }
  func.func @transform_10(%arg0: i32) -> (i32, i32) {
    %c0_i32 = arith.constant 0 : i32
    %c0_i32_0 = arith.constant 0 : i32
    return %arg0, %c0_i32 : i32, i32
  }
}

</mosaic_0001>

<bundles_post_ra>
// kernel: nwfnet_forward.1
= control target key start
LH: loop header
LB: loop body
LE: loop exit
PB: predicated region body
PF: predicated region fallthrough
CT: control target
= control target key end

     0   :  { %15 = vsyncpa [#allocation3], 0  ;;  %s3298_s0 = inlined_call_operand.vmem [shape: f32[64,32], index: 0, kind: input, shape index: {}]   ;;  %s3299_s1 = inlined_call_operand.hbm [shape: bf16[32,128], index: 1, kind: input, shape index: {}]   ;;  %s3300_s2 = inlined_call_operand.hbm [shape: bf16[128,512], index: 2, kind: input, shape index: {}]   ;;  %s3301_s3 = inlined_call_operand.hbm [shape: bf16[512,256], index: 3, kind: input, shape index: {}]   ;;  %s3302_s4 = inlined_call_operand.hbm [shape: bf16[256,128], index: 4, kind: input, shape index: {}]   ;;  %s3303_s5 = inlined_call_operand.vmem [shape: bf16[128,128], index: 5, kind: input, shape index: {}]   ;;  %s3304_s6 = inlined_call_operand.hbm [shape: bf16[128,128], index: 6, kind: input, shape index: {}]   ;;  %s3305_s7 = inlined_call_operand.hbm [shape: bf16[128,128], index: 7, kind: input, shape index: {}]   ;;  %s3306_s8 = inlined_call_operand.hbm [shape: bf16[128,128], index: 8, kind: input, shape index: {}]   ;;  %s3307_s9 = inlined_call_operand.vmem [shape: f32[8,512], index: 9, kind: input, shape index: {}]   ;;  %s3308_s10 = inlined_call_operand.vmem [shape: f32[64,128], index: 10, kind: output, shape index: {}]  }
   0x1   :  { %16 = vsyncpa [#allocation5], 0 }
   0x2   :  { %17 = vsyncpa [#allocation8], 0 }
   0x3   :  { %18 = vsyncpa [#allocation11], 0  ;;  %s3088_s13 = smov 0  }
   0x4 LB: > { %s3019_s14 = smov [#allocation4]   ;;  %s2198_s16 = sadd.s32 4294967295, %s3017_s13   ;;  %s3017_s13 = sphi %s3088_s13, %s24_s13  }
   0x5   : > { %s295_s15 = sshll.u32 %s3019_s14, 4  ;;  %p2200_p0 = scmp.ge.s32.totalorder %s3017_s13, 1  ;;  %s296_s15 = int_to_ptr.vmem [resolvable:$true] %s295_s15 }
   0x6   : > { %p270_p1 = scmp.lt.s32.totalorder %s3017_s13, 3  ;;  %p3098_p2 = scmp.eq.s32.totalorder %s2198_s16, 0 }
   0x7   : > { %s3020_s20 = smov [#allocation7]   ;;  %s3021_s22 = smov [#allocation10]  }
   0x8   : > { %p3102_p3 = pnand %p2200_p0, %p270_p1  ;;  %s321_s21 = sshll.u32 %s3020_s20, 4  ;;  %s3114_s21 = int_to_ptr.vmem [resolvable:$true] %s321_s21 }
   0x9   : > { %s350_s23 = sshll.u32 %s3021_s22, 4  ;;  %s2824_s25 = scalar_lea.vmem %s296_s15, 4096  ;;  %s3116_s23 = int_to_ptr.vmem [resolvable:$true] %s350_s23 }
   0xa   : > { %p2561_p4 = pneg %p3102_p3  ;;  %p2825_p7 = scmp.ne.s32.totalorder %s296_s15, %s2824_s25 }
   0xb   : > { %p2832_p10 = scmp.lt.s32.totalorder %s296_s15, %s296_s15  ;;  %p2833_p11 = scmp.lt.s32.totalorder %s2824_s25, %s2824_s25 }
   0xc   : > { %p3110_p5 = pnand %p3098_p2, %p2561_p4 }
   0xd   : > { %p2834_p12 = por %p2833_p11, %p2832_p10 }
   0xe   : > { %p3120_p6 = pneg %p3110_p5 }
  0x10   : > { %p2827_p8 = pnand %p2825_p7, %p3120_p6 }
  0x12   : > { %p2828_p9 = pneg %p2827_p8 }
  0x14   : > { %p2835_p13 = pnand %p2834_p12, %p2828_p9 }
  0x16   : > { %2838 = shalt.err (!%p2835_p13)
}
  0x17   : > { %s3022_s26 = smov 256   ;;  %s3023_s27 = smov 16  }
  0x18   : > { %2567 = dma.hbm_to_vmem [thread:$0]  (!%p3110_p5), %s3300_s2, 4096, %s296_s15, [#allocation5], %s3022_s26, %s3022_s26, %s3023_s27  }
  0x19   : > { %s2850_s30 = scalar_lea.vmem %s3114_s21, 2048  ;;  %p2858_p7 = scmp.lt.s32.totalorder %s3114_s21, %s3114_s21 }
  0x1a   : > { %p2851_p0 = scmp.ne.s32.totalorder %s3114_s21, %s2850_s30  ;;  %p2859_p8 = scmp.lt.s32.totalorder %s2850_s30, %s2850_s30 }
  0x1c   : > { %p2853_p1 = pnand %p2851_p0, %p3120_p6  ;;  %p2860_p9 = por %p2859_p8, %p2858_p7 }
  0x1e   : > { %p2854_p4 = pneg %p2853_p1 }
  0x20   : > { %p2861_p10 = pnand %p2860_p9, %p2854_p4 }
  0x22   : > { %2864 = shalt.err (!%p2861_p10)
}
  0x23   : > { %s3024_s11 = smov 64   ;;  %s3025_s12 = smov 4  }
  0x24   : > { %2573 = dma.hbm_to_vmem [thread:$0]  (!%p3110_p5), %s3302_s4, 2048, %s3114_s21, [#allocation8], %s3024_s11, %s3024_s11, %s3025_s12  }
  0x25   : > { %s2876_s20 = scalar_lea.vmem %s3116_s23, 1024  ;;  %p2884_p0 = scmp.lt.s32.totalorder %s3116_s23, %s3116_s23 }
  0x26   : > { %p2877_p11 = scmp.ne.s32.totalorder %s3116_s23, %s2876_s20  ;;  %p2885_p1 = scmp.lt.s32.totalorder %s2876_s20, %s2876_s20 }
  0x28   : > { %p2879_p12 = pnand %p2877_p11, %p3120_p6  ;;  %p2886_p4 = por %p2885_p1, %p2884_p0 }
  0x2a   : > { %p2880_p13 = pneg %p2879_p12 }
  0x2c   : > { %p2887_p7 = pnand %p2886_p4, %p2880_p13 }
  0x2e   : > { %2890 = shalt.err (!%p2887_p7)
}
  0x2f   : > { %2579 = dma.hbm_to_vmem [thread:$0]  (!%p3110_p5), %s3305_s7, 1024, %s3116_s23, [#allocation11], %s3024_s11, %s3024_s11, %s3025_s12  }
  0x30   : > { %s3026_s21 = smov [#allocation2]   ;;  %s3027_s27 = smov [#allocation6]  }
  0x31   : > { %s282_s26 = sshll.u32 %s3026_s21, 4  ;;  %s308_s28 = sshll.u32 %s3027_s27, 4  ;;  %s283_s26 = int_to_ptr.vmem [resolvable:$true] %s282_s26  ;;  %s309_s28 = int_to_ptr.vmem [resolvable:$true] %s308_s28 }
  0x32   : > { %s2902_s29 = scalar_lea.vmem %s283_s26, 256  ;;  %p2910_p11 = scmp.lt.s32.totalorder %s283_s26, %s283_s26 }
  0x33   : > { %p2903_p8 = scmp.ne.s32.totalorder %s283_s26, %s2902_s29  ;;  %p2911_p12 = scmp.lt.s32.totalorder %s2902_s29, %s2902_s29 }
  0x35   : > { %p2905_p9 = pnand %p2903_p8, %p3120_p6  ;;  %p2912_p13 = por %p2911_p12, %p2910_p11 }
  0x37   : > { %p2906_p10 = pneg %p2905_p9 }
  0x39   : > { %p2913_p0 = pnand %p2912_p13, %p2906_p10 }
  0x3b   : > { %2916 = shalt.err (!%p2913_p0)
}
  0x3c   : > { %2564 = dma.hbm_to_vmem [thread:$0]  (!%p3110_p5), %s3299_s1, 256, %s283_s26, [#allocation3], %s3024_s11, %s3024_s11, %s3025_s12  }
  0x3d   : > { %s2928_s14 = scalar_lea.vmem %s309_s28, 8192  ;;  %p2936_p8 = scmp.lt.s32.totalorder %s309_s28, %s309_s28 }
  0x3e   : > { %p2929_p1 = scmp.ne.s32.totalorder %s309_s28, %s2928_s14  ;;  %p2937_p9 = scmp.lt.s32.totalorder %s2928_s14, %s2928_s14 }
  0x40   : > { %p2931_p4 = pnand %p2929_p1, %p3120_p6  ;;  %p2938_p11 = por %p2937_p9, %p2936_p8 }
  0x42   : > { %p2932_p7 = pneg %p2931_p4 }
  0x44   : > { %p2939_p10 = pnand %p2938_p11, %p2932_p7 }
  0x46   : > { %2942 = shalt.err (!%p2939_p10)
}
  0x47   : > { %s3028_s15 = smov 128   ;;  %s3029_s20 = smov 8  }
  0x48   : > { %2570 = dma.hbm_to_vmem [thread:$0]  (!%p3110_p5), %s3301_s3, 8192, %s309_s28, [#allocation5], %s3028_s15, %s3028_s15, %s3029_s20  }
  0x49   : > { %s3030_s21 = smov [#allocation9]   ;;  %s3031_s27 = smov [#allocation12]  }
  0x4a   : > { %s337_s26 = sshll.u32 %s3030_s21, 4  ;;  %s363_s29 = sshll.u32 %s3031_s27, 4  ;;  %s338_s26 = int_to_ptr.vmem [resolvable:$true] %s337_s26  ;;  %s364_s29 = int_to_ptr.vmem [resolvable:$true] %s363_s29 }
  0x4b   : > { %s2954_s23 = scalar_lea.vmem %s338_s26, 1024  ;;  %p2962_p1 = scmp.lt.s32.totalorder %s338_s26, %s338_s26 }
  0x4c   : > { %p2955_p12 = scmp.ne.s32.totalorder %s338_s26, %s2954_s23  ;;  %p2963_p4 = scmp.lt.s32.totalorder %s2954_s23, %s2954_s23 }
  0x4e   : > { %p2957_p13 = pnand %p2955_p12, %p3120_p6  ;;  %p2964_p7 = por %p2963_p4, %p2962_p1 }
  0x50   : > { %p2958_p0 = pneg %p2957_p13 }
  0x52   : > { %p2965_p8 = pnand %p2964_p7, %p2958_p0 }
  0x54   : > { %2968 = shalt.err (!%p2965_p8)
}
  0x55   : > { %2576 = dma.hbm_to_vmem [thread:$0]  (!%p3110_p5), %s3304_s6, 1024, %s338_s26, [#allocation8], %s3024_s11, %s3024_s11, %s3025_s12  }
  0x56   : > { %s2980_s14 = scalar_lea.vmem %s364_s29, 1024  ;;  %p2988_p12 = scmp.lt.s32.totalorder %s364_s29, %s364_s29 }
  0x57   : > { %p2981_p9 = scmp.ne.s32.totalorder %s364_s29, %s2980_s14  ;;  %p2989_p13 = scmp.lt.s32.totalorder %s2980_s14, %s2980_s14 }
  0x59   : > { %p2983_p11 = pnand %p2981_p9, %p3120_p6  ;;  %p2990_p1 = por %p2989_p13, %p2988_p12 }
  0x5b   : > { %p2984_p10 = pneg %p2983_p11 }
  0x5d   : > { %p2991_p0 = pnand %p2990_p1, %p2984_p10 }
  0x5f   : > { %2994 = shalt.err (!%p2991_p0)
}
  0x60   : > { %2582 = dma.hbm_to_vmem [thread:$0]  (!%p3110_p5), %s3306_s8, 1024, %s364_s29, [#allocation11], %s3024_s11, %s3024_s11, %s3025_s12  }
  0x61   : > { %391 = sbr.rel (%p3102_p3) target bundleno = 1773 (0x6ed), region = 60 }
  0x66   : > { %3000 = dma.done.wait (%p3098_p2), [#allocation3], 256  }
  0x67   : > { %3002 = vsyncadd (%p3098_p2), [#allocation3], 4294967040 }
  0x68   : > { %3004 = dma.done.wait (%p3098_p2), [#allocation5], 12288  }
  0x69   : > { %3006 = vsyncadd (%p3098_p2), [#allocation5], 4294955008 }
  0x6a   : > { %3008 = dma.done.wait (%p3098_p2), [#allocation8], 3072  }
  0x6b   : > { %3010 = vsyncadd (%p3098_p2), [#allocation8], 4294964224 }
  0x6c   : > { %3012 = dma.done.wait (%p3098_p2), [#allocation11], 2048  }
  0x6d   : > { %3014 = vsyncadd (%p3098_p2), [#allocation11], 4294965248  ;;  %s2217_s18 = sshll.u32 %s2198_s16, 2  ;;  %v2619_v0 = vld [vmem:[#allocation2 + $0x8] sm:$0xff]   ;;  %v2620_v1 = vld [vmem:[#allocation2] sm:$0xff]   ;;  %vm489_vm0 = vcmask 261120  }
  0x6e   : > { %p454_p3 = scmp.lt.s32.totalorder %s2217_s18, 7  ;;  %2445 = vmatprep.subr.bf16.mxu0 %v2619_v0  ;;  %v2621_v7 = vld [vmem:[#allocation4 + $0xe4] ss:$16 sps:$4 sm:$0xff]   ;;  %v2625_v8 = vld [vmem:[#allocation4 + $0xec] ss:$16 sps:$4 sm:$0xff]   ;;  %v3032_v40 = vmov 0  }
  0x6f   : > { %2446 = vmatpush3.bf16.msra.mxu0 %v2619_v0  ;;  %v2626_v9 = vld [vmem:[#allocation4 + $0xe0] ss:$16 sps:$4 sm:$0xff]   ;;  %766 = vmatprep.subr.bf16.mxu1 %v2621_v7  ;;  %v2627_v11 = vld [vmem:[#allocation4 + $0xc4] ss:$16 sps:$4 sm:$0xff]   ;;  %v2623_v12 = vld [vmem:[#allocation4 + $0xe8] ss:$16 sps:$4 sm:$0xff]  }
  0x70   : > { %s3314_s18 = smov (!%p454_p3, %s2217_s18), 7  ;;  %2447 = vmatprep.subr.bf16.mxu0 %v2620_v1  ;;  %767 = vmatpush1.bf16.msra.mxu1 %v2626_v9  ;;  %v2631_v13 = vld [vmem:[#allocation4 + $0xcc] ss:$16 sps:$4 sm:$0xff]   ;;  %v2632_v14 = vld [vmem:[#allocation4 + $0xc0] ss:$16 sps:$4 sm:$0xff]  }
  0x71   : > { %s2218_s19 = sshll.u32 %s3314_s18, 3  ;;  %768 = vmatprep.subr.bf16.mxu1 %v2627_v11  ;;  %v2633_v15 = vld [vmem:[#allocation4 + $0xa4] ss:$16 sps:$4 sm:$0xff]   ;;  %v2629_v16 = vld [vmem:[#allocation4 + $0xc8] ss:$16 sps:$4 sm:$0xff]   ;;  %798 = vmatprep.mubr.bf16.mxu1 %v3032_v40 }
  0x72   : > { %s457_s12 = scalar_lea.vmem %s3298_s0, %s2218_s19  ;;  %v2637_v17 = vld [vmem:[#allocation4 + $0xac] ss:$16 sps:$4 sm:$0xff]   ;;  %v2638_v18 = vld [vmem:[#allocation4 + $0xa0] ss:$16 sps:$4 sm:$0xff]   ;;  %v2639_v19 = vld [vmem:[#allocation4 + $0x84] ss:$16 sps:$4 sm:$0xff]   ;;  %s463_s11 = scalar_lea.vmem %s3308_s10, %s2218_s19 }
  0x73   : > { %v466_v2 = vld [vmem:[%s457_s12] sm:$0xff]  ;;  %v467_v3 = vld [vmem:[%s457_s12 + $0x8] sm:$0xff]  ;;  %v468_v4 = vld [vmem:[%s457_s12 + $0x10] sm:$0xff]  ;;  %2448 = vmatpush3.bf16.msra.mxu0 %v2620_v1 }
  0x74   : > { %v475_v5 = vpack.c.bf16 %v467_v3, %v466_v2  ;;  %v469_v6 = vld [vmem:[%s457_s12 + $0x18] sm:$0xff]  ;;  %819 = vmatprep.subr.bf16.mxu0 %v2625_v8  ;;  %769 = vmatpush1.bf16.msra.mxu1 %v2632_v14  ;;  %v2644_v21 = vld [vmem:[#allocation4 + $0x80] ss:$16 sps:$4 sm:$0xff]   ;;  %v2645_v23 = vld [vmem:[#allocation4 + $0x64] ss:$16 sps:$4 sm:$0xff]  }
  0x75   : > { %v476_v10 = vpack.c.bf16 %v469_v6, %v468_v4  ;;  %770 = vmatprep.subr.bf16.mxu1 %v2633_v15  ;;  %v2635_v20 = vld [vmem:[#allocation4 + $0xa8] ss:$16 sps:$4 sm:$0xff]   ;;  %v2643_v22 = vld [vmem:[#allocation4 + $0x8c] ss:$16 sps:$4 sm:$0xff]   ;;  %v2650_v25 = vld [vmem:[#allocation4 + $0x60] ss:$16 sps:$4 sm:$0xff]  }
  0x76   : > { %2449 = vmatprep.mubr.msk.bf16.mxu0 %vm489_vm0, %v475_v5  ;;  %v2641_v24 = vld [vmem:[#allocation4 + $0x88] ss:$16 sps:$4 sm:$0xff]   ;;  %v2649_v26 = vld [vmem:[#allocation4 + $0x6c] ss:$16 sps:$4 sm:$0xff]   ;;  %v2651_v28 = vld [vmem:[#allocation4 + $0x44] ss:$16 sps:$4 sm:$0xff]  }
  0x77   : > { %2450 = vmatmul.mubr.msk.bf16.vlgmr.msra.gmra.mxu0 %vm489_vm0, %v476_v10  ;;  %v2647_v27 = vld [vmem:[#allocation4 + $0x68] ss:$16 sps:$4 sm:$0xff]   ;;  %v2655_v29 = vld [vmem:[#allocation4 + $0x4c] ss:$16 sps:$4 sm:$0xff]   ;;  %v2656_v31 = vld [vmem:[#allocation4 + $0x40] ss:$16 sps:$4 sm:$0xff]  }
  0x78   : > { %820 = vmatpush1.bf16.msra.mxu0 %v2623_v12  ;;  %771 = vmatpush1.bf16.msra.mxu1 %v2638_v18  ;;  %v2653_v30 = vld [vmem:[#allocation4 + $0x48] ss:$16 sps:$4 sm:$0xff]   ;;  %v2657_v32 = vld [vmem:[#allocation4 + $0x24] ss:$16 sps:$4 sm:$0xff]   ;;  %v2661_v33 = vld [vmem:[#allocation4 + $0x2c] ss:$16 sps:$4 sm:$0xff]  }
  0x79   : > { %821 = vmatprep.subr.bf16.mxu0 %v2631_v13  ;;  %772 = vmatprep.subr.bf16.mxu1 %v2639_v19  ;;  %v2659_v34 = vld [vmem:[#allocation4 + $0x28] ss:$16 sps:$4 sm:$0xff]   ;;  %v2662_v35 = vld [vmem:[#allocation4 + $0x20] ss:$16 sps:$4 sm:$0xff]   ;;  %v2663_v36 = vld [vmem:[#allocation4 + $0x4] ss:$16 sps:$4 sm:$0xff]  }
  0x7a   : > { %v2667_v37 = vld [vmem:[#allocation4 + $0xc] ss:$16 sps:$4 sm:$0xff]   ;;  %v2665_v38 = vld [vmem:[#allocation4 + $0x8] ss:$16 sps:$4 sm:$0xff]   ;;  %v2668_v39 = vld [vmem:[#allocation4] ss:$16 sps:$4 sm:$0xff]   ;;  %851 = vmatprep.mubr.bf16.mxu0 %v3032_v40 }
  0x7b   : > { %v2671_v41 = vld [vmem:[#allocation6 + $0x74] ss:$8 sps:$4 sm:$0xff]   ;;  %v474_v45 = vld [vmem:[%s3307_s9] ss:$0 sm:$0xff]  ;;  %v2677_v56 = vld [vmem:[#allocation6 + $0x64] ss:$8 sps:$4 sm:$0xff]  }
  0x7c   : > { %822 = vmatpush1.bf16.msra.mxu0 %v2629_v16  ;;  %773 = vmatpush1.bf16.msra.mxu1 %v2644_v21  ;;  %v2674_v42 = vld [vmem:[#allocation6 + $0x174] ss:$8 sps:$4 sm:$0xff]   ;;  %v2669_v54 = vld [vmem:[#allocation6 + $0x70] ss:$8 sps:$4 sm:$0xff]   ;;  %v2680_v57 = vld [vmem:[#allocation6 + $0x164] ss:$8 sps:$4 sm:$0xff]  }
  0x7d   : > { %823 = vmatprep.subr.bf16.mxu0 %v2637_v17  ;;  %774 = vmatprep.subr.bf16.mxu1 %v2645_v23  ;;  %v2672_v55 = vld [vmem:[#allocation6 + $0x170] ss:$8 sps:$4 sm:$0xff]   ;;  %v2675_v60 = vld [vmem:[#allocation6 + $0x60] ss:$8 sps:$4 sm:$0xff]   ;;  %v2683_v62 = vld [vmem:[#allocation6 + $0x54] ss:$8 sps:$4 sm:$0xff]  }
  0x7e   : > { %v2678_v61 = vld [vmem:[#allocation6 + $0x160] ss:$8 sps:$4 sm:$0xff]   ;;  %v2686_v63 = vld [vmem:[#allocation6 + $0x154] ss:$8 sps:$4 sm:$0xff]   ;;  %v2681_v2 = vld [vmem:[#allocation6 + $0x50] ss:$8 sps:$4 sm:$0xff]  }
  0x7f   : > { %v2684_v3 = vld [vmem:[#allocation6 + $0x150] ss:$8 sps:$4 sm:$0xff]   ;;  %v2689_v4 = vld [vmem:[#allocation6 + $0x44] ss:$8 sps:$4 sm:$0xff]   ;;  %v2687_v6 = vld [vmem:[#allocation6 + $0x40] ss:$8 sps:$4 sm:$0xff]  }
  0x80   : > { %824 = vmatpush1.bf16.msra.mxu0 %v2635_v20  ;;  %775 = vmatpush1.bf16.msra.mxu1 %v2650_v25  ;;  %v2692_v5 = vld [vmem:[#allocation6 + $0x144] ss:$8 sps:$4 sm:$0xff]   ;;  %v2690_v7 = vld [vmem:[#allocation6 + $0x140] ss:$8 sps:$4 sm:$0xff]   ;;  %v2695_v8 = vld [vmem:[#allocation6 + $0x34] ss:$8 sps:$4 sm:$0xff]  }
  0x81   : > { %825 = vmatprep.subr.bf16.mxu0 %v2643_v22  ;;  %776 = vmatprep.subr.bf16.mxu1 %v2651_v28  ;;  %v2698_v9 = vld [vmem:[#allocation6 + $0x134] ss:$8 sps:$4 sm:$0xff]   ;;  %v2693_v10 = vld [vmem:[#allocation6 + $0x30] ss:$8 sps:$4 sm:$0xff]   ;;  %v2701_v12 = vld [vmem:[#allocation6 + $0x24] ss:$8 sps:$4 sm:$0xff]  }
  0x82   : > { %v2696_v11 = vld [vmem:[#allocation6 + $0x130] ss:$8 sps:$4 sm:$0xff]   ;;  %v2704_v13 = vld [vmem:[#allocation6 + $0x124] ss:$8 sps:$4 sm:$0xff]   ;;  %v2699_v14 = vld [vmem:[#allocation6 + $0x20] ss:$8 sps:$4 sm:$0xff]  }
  0x83   : > { %v2702_v15 = vld [vmem:[#allocation6 + $0x120] ss:$8 sps:$4 sm:$0xff]   ;;  %v2707_v16 = vld [vmem:[#allocation6 + $0x14] ss:$8 sps:$4 sm:$0xff]   ;;  %v2705_v18 = vld [vmem:[#allocation6 + $0x10] ss:$8 sps:$4 sm:$0xff]  }
  0x84   : > { %826 = vmatpush1.bf16.msra.mxu0 %v2641_v24  ;;  %777 = vmatpush1.bf16.msra.mxu1 %v2656_v31  ;;  %v2710_v17 = vld [vmem:[#allocation6 + $0x114] ss:$8 sps:$4 sm:$0xff]   ;;  %v2708_v19 = vld [vmem:[#allocation6 + $0x110] ss:$8 sps:$4 sm:$0xff]   ;;  %v2713_v20 = vld [vmem:[#allocation6 + $0x4] ss:$8 sps:$4 sm:$0xff]  }
  0x85   : > { %827 = vmatprep.subr.bf16.mxu0 %v2649_v26  ;;  %778 = vmatprep.subr.bf16.mxu1 %v2657_v32  ;;  %v2716_v21 = vld [vmem:[#allocation6 + $0x104] ss:$8 sps:$4 sm:$0xff]   ;;  %v2711_v22 = vld [vmem:[#allocation6] ss:$8 sps:$4 sm:$0xff]   ;;  %v2719_v24 = vld [vmem:[#allocation6 + $0xf4] ss:$8 sps:$4 sm:$0xff]  }
  0x86   : > { %v2714_v23 = vld [vmem:[#allocation6 + $0x100] ss:$8 sps:$4 sm:$0xff]   ;;  %v2722_v25 = vld [vmem:[#allocation6 + $0x1f4] ss:$8 sps:$4 sm:$0xff]   ;;  %v2717_v26 = vld [vmem:[#allocation6 + $0xf0] ss:$8 sps:$4 sm:$0xff]  }
  0x87   : > { %v2725_v28 = vld [vmem:[#allocation6 + $0xe4] ss:$8 sps:$4 sm:$0xff]   ;;  %v2726_v31 = vld [vmem:[#allocation6 + $0x1e0] ss:$8 sps:$4 sm:$0xff]   ;;  %v2731_v32 = vld [vmem:[#allocation6 + $0xd4] ss:$8 sps:$4 sm:$0xff]  }
  0x88   : > { %828 = vmatpush1.bf16.msra.mxu0 %v2647_v27  ;;  %779 = vmatpush1.bf16.msra.mxu1 %v2662_v35  ;;  %v2720_v27 = vld [vmem:[#allocation6 + $0x1f0] ss:$8 sps:$4 sm:$0xff]  }
  0x89   : > { %829 = vmatprep.subr.bf16.mxu0 %v2655_v29  ;;  %780 = vmatprep.subr.bf16.mxu1 %v2663_v36  ;;  %v2728_v29 = vld [vmem:[#allocation6 + $0x1e4] ss:$8 sps:$4 sm:$0xff]   ;;  %v2732_v35 = vld [vmem:[#allocation6 + $0x1d0] ss:$8 sps:$4 sm:$0xff]  }
  0x8a   : > { %v2737_v36 = vld [vmem:[#allocation6 + $0xc4] ss:$8 sps:$4 sm:$0xff]  }
  0x8c   : > { %830 = vmatpush1.bf16.msra.mxu0 %v2653_v30  ;;  %781 = vmatpush1.bf16.msra.mxu1 %v2668_v39  ;;  %v2723_v30 = vld [vmem:[#allocation6 + $0xe0] ss:$8 sps:$4 sm:$0xff]  }
  0x8d   : > { %831 = vmatprep.subr.bf16.mxu0 %v2661_v33  ;;  %1293 = vmatprep.subr.bf16.mxu1 %v2671_v41  ;;  %v2734_v33 = vld [vmem:[#allocation6 + $0x1d4] ss:$8 sps:$4 sm:$0xff]   ;;  %v2738_v39 = vld [vmem:[#allocation6 + $0x1c0] ss:$8 sps:$4 sm:$0xff]  }
  0x8e   : > { %v2746_v41 = vld [vmem:[#allocation6 + $0x1b4] ss:$8 sps:$4 sm:$0xff]  }
  0x90   : > { %832 = vmatpush1.bf16.msra.mxu0 %v2659_v34  ;;  %v2729_v34 = vld [vmem:[#allocation6 + $0xd0] ss:$8 sps:$4 sm:$0xff]  }
  0x91   : > { %833 = vmatprep.subr.bf16.mxu0 %v2667_v37  ;;  %v2740_v37 = vld [vmem:[#allocation6 + $0x1c4] ss:$8 sps:$4 sm:$0xff]  }
  0x94   : > { %834 = vmatpush1.bf16.msra.mxu0 %v2665_v38  ;;  %v2735_v38 = vld [vmem:[#allocation6 + $0xc0] ss:$8 sps:$4 sm:$0xff]  }
  0x95   : > { %1346 = vmatprep.subr.bf16.mxu0 %v2674_v42  ;;  %v2741_v42 = vld [vmem:[#allocation6 + $0xb0] ss:$8 sps:$4 sm:$0xff]  }
 0x137   : > { %v2451_v43 = vpop.f32.mrf.mxu0 }
 0x138   : > { %v539_v58 = vadd.f32 %v2451_v43, %v474_v45  ;;  %v2744_v43 = vld [vmem:[#allocation6 + $0x1b0] ss:$8 sps:$4 sm:$0xff]  }
 0x139   : > { %v530_v44 = vpop.f32.mrf.mxu0 }
 0x13a   : > { %v531_v47 = vadd.f32 %v530_v44, %v474_v45  ;;  %v547_v0 = vmax.f32 %v539_v58, 0.0  ;;  %v2749_v44 = vld [vmem:[#allocation6 + $0xa4] ss:$8 sps:$4 sm:$0xff]  }
 0x13b   : > { %v2452_v46 = vpop.f32.mrf.mxu0 }
 0x13c   : > { %v545_v50 = vmax.f32 %v531_v47, 0.0  ;;  %v542_v52 = vadd.f32 %v2452_v46, %v474_v45  ;;  %v2747_v46 = vld [vmem:[#allocation6 + $0xa0] ss:$8 sps:$4 sm:$0xff]  }
 0x13d   : > { %v533_v48 = vpop.f32.mrf.mxu0  ;;  %v2750_v47 = vld [vmem:[#allocation6 + $0x1a0] ss:$8 sps:$4 sm:$0xff]  }
 0x13e   : > { %v534_v49 = vadd.f32 %v533_v48, %v474_v45  ;;  %v548_v59 = vmax.f32 %v542_v52, 0.0  ;;  %v2752_v45 = vld [vmem:[#allocation6 + $0x1a4] ss:$8 sps:$4 sm:$0xff]   ;;  %v2755_v48 = vld [vmem:[#allocation6 + $0x94] ss:$8 sps:$4 sm:$0xff]  }
 0x13f   : > { %v2761_v52 = vld [vmem:[#allocation6 + $0x84] ss:$8 sps:$4 sm:$0xff]  }
 0x140   : > { %v546_v51 = vmax.f32 %v534_v49, 0.0  ;;  %v584_v1 = vpack.c.bf16 %v548_v59, %v547_v0  ;;  %v2758_v49 = vld [vmem:[#allocation6 + $0x194] ss:$8 sps:$4 sm:$0xff]  }
 0x142   : > { %v583_v53 = vpack.c.bf16 %v546_v51, %v545_v50  ;;  %v2753_v50 = vld [vmem:[#allocation6 + $0x90] ss:$8 sps:$4 sm:$0xff]  }
 0x143   : > { %v2756_v51 = vld [vmem:[#allocation6 + $0x190] ss:$8 sps:$4 sm:$0xff]  }
 0x144   : > { %799 = vmatmul.mubr.bf16.vlgmr.msra.gmra.mxu1 %v583_v53  ;;  %852 = vmatmul.mubr.bf16.vlgmr.msra.gmra.mxu0 %v583_v53  ;;  %v2764_v53 = vld [vmem:[#allocation6 + $0x184] ss:$8 sps:$4 sm:$0xff]  }
 0x145   : > { %808 = vmatprep.mubr.bf16.mxu1 %v3032_v40  ;;  %861 = vmatprep.mubr.bf16.mxu0 %v3032_v40  ;;  %v2743_v40 = vld [vmem:[#allocation6 + $0xb4] ss:$8 sps:$4 sm:$0xff]  }
 0x146   : > { %1294 = vmatpush1.bf16.msra.mxu1 %v2669_v54  ;;  %1347 = vmatpush1.bf16.msra.mxu0 %v2672_v55  ;;  %v2759_v54 = vld [vmem:[#allocation6 + $0x80] ss:$8 sps:$4 sm:$0xff]  }
 0x147   : > { %1295 = vmatprep.subr.bf16.mxu1 %v2677_v56  ;;  %1348 = vmatprep.subr.bf16.mxu0 %v2680_v57  ;;  %v2762_v55 = vld [vmem:[#allocation6 + $0x180] ss:$8 sps:$4 sm:$0xff]   ;;  %v2765_v56 = vld [vmem:[#allocation7 + $0x78] sm:$0xff]   ;;  %v586_v57 = vlaneseq }
 0x149   : > { %v3231_v58 = vshrl.u32 %v586_v57, 7 }
 0x14a   : > { %1296 = vmatpush1.bf16.msra.mxu1 %v2675_v60  ;;  %1349 = vmatpush1.bf16.msra.mxu0 %v2678_v61 }
 0x14b   : > { %1297 = vmatprep.subr.bf16.mxu1 %v2683_v62  ;;  %1350 = vmatprep.subr.bf16.mxu0 %v2686_v63  ;;  %v592_v59 = vsub.s32 1, %v3231_v58  ;;  %v600_v60 = vsub.s32 3, %v3231_v58  ;;  %v588_v61 = vsub.s32 0, %v3231_v58  ;;  %v596_v62 = vsub.s32 2, %v3231_v58 }
 0x14c   : > { %809 = vmatmul.mubr.bf16.gmra.mxu1 %v584_v1  ;;  %862 = vmatmul.mubr.bf16.gmra.mxu0 %v584_v1  ;;  %v2225_v63 = vld [vmem:[%s3307_s9 + $0x1] ss:$8 sm:$0xf] }
 0x14e   : > { %1298 = vmatpush1.bf16.msra.mxu1 %v2681_v2  ;;  %1351 = vmatpush1.bf16.msra.mxu0 %v2684_v3  ;;  %v593_v2 = vrot.slane %v2225_v63, %v592_v59  ;;  %v601_v3 = vrot.slane %v2225_v63, %v600_v60 }
 0x14f   : > { %1299 = vmatprep.subr.bf16.mxu1 %v2689_v4  ;;  %1352 = vmatprep.subr.bf16.mxu0 %v2692_v5  ;;  %v589_v4 = vrot.slane %v2225_v63, %v588_v61  ;;  %v597_v5 = vrot.slane %v2225_v63, %v596_v62 }
 0x152   : > { %1300 = vmatpush1.bf16.msra.mxu1 %v2687_v6  ;;  %1353 = vmatpush1.bf16.msra.mxu0 %v2690_v7 }
 0x153   : > { %1301 = vmatprep.subr.bf16.mxu1 %v2695_v8  ;;  %1354 = vmatprep.subr.bf16.mxu0 %v2698_v9 }
 0x156   : > { %1302 = vmatpush1.bf16.msra.mxu1 %v2693_v10  ;;  %1355 = vmatpush1.bf16.msra.mxu0 %v2696_v11 }
 0x157   : > { %1303 = vmatprep.subr.bf16.mxu1 %v2701_v12  ;;  %1356 = vmatprep.subr.bf16.mxu0 %v2704_v13 }
 0x15a   : > { %1304 = vmatpush1.bf16.msra.mxu1 %v2699_v14  ;;  %1357 = vmatpush1.bf16.msra.mxu0 %v2702_v15 }
 0x15b   : > { %1305 = vmatprep.subr.bf16.mxu1 %v2707_v16  ;;  %1358 = vmatprep.subr.bf16.mxu0 %v2710_v17 }
 0x15e   : > { %1306 = vmatpush1.bf16.msra.mxu1 %v2705_v18  ;;  %1359 = vmatpush1.bf16.msra.mxu0 %v2708_v19 }
 0x15f   : > { %1307 = vmatprep.subr.bf16.mxu1 %v2713_v20  ;;  %1360 = vmatprep.subr.bf16.mxu0 %v2716_v21 }
 0x162   : > { %1308 = vmatpush1.bf16.msra.mxu1 %v2711_v22  ;;  %1361 = vmatpush1.bf16.msra.mxu0 %v2714_v23 }
 0x163   : > { %1309 = vmatprep.subr.bf16.mxu1 %v2719_v24  ;;  %1362 = vmatprep.subr.bf16.mxu0 %v2722_v25 }
 0x166   : > { %1310 = vmatpush2.bf16.msra.mxu1 %v2717_v26  ;;  %1363 = vmatpush2.bf16.msra.mxu0 %v2720_v27 }
 0x167   : > { %1311 = vmatprep.subr.bf16.mxu1 %v2725_v28  ;;  %1364 = vmatprep.subr.bf16.mxu0 %v2728_v29 }
 0x16a   : > { %1312 = vmatpush2.bf16.msra.mxu1 %v2723_v30  ;;  %1365 = vmatpush2.bf16.msra.mxu0 %v2726_v31 }
 0x16b   : > { %1313 = vmatprep.subr.bf16.mxu1 %v2731_v32  ;;  %1366 = vmatprep.subr.bf16.mxu0 %v2734_v33 }
 0x16e   : > { %1314 = vmatpush2.bf16.msra.mxu1 %v2729_v34  ;;  %1367 = vmatpush2.bf16.msra.mxu0 %v2732_v35  ;;  %v2766_v34 = vld [vmem:[#allocation7 + $0x38] sm:$0xff]  }
 0x16f   : > { %1315 = vmatprep.subr.bf16.mxu1 %v2737_v36  ;;  %1368 = vmatprep.subr.bf16.mxu0 %v2740_v37 }
 0x172   : > { %1316 = vmatpush2.bf16.msra.mxu1 %v2735_v38  ;;  %1369 = vmatpush2.bf16.msra.mxu0 %v2738_v39 }
 0x173   : > { %1317 = vmatprep.subr.bf16.mxu1 %v2743_v40  ;;  %1370 = vmatprep.subr.bf16.mxu0 %v2746_v41  ;;  %v2767_v40 = vld [vmem:[#allocation7 + $0x70] sm:$0xff]  }
 0x176   : > { %1318 = vmatpush2.bf16.msra.mxu1 %v2741_v42  ;;  %1371 = vmatpush2.bf16.msra.mxu0 %v2744_v43 }
 0x177   : > { %1319 = vmatprep.subr.bf16.mxu1 %v2749_v44  ;;  %1372 = vmatprep.subr.bf16.mxu0 %v2752_v45 }
 0x17a   : > { %1320 = vmatpush2.bf16.msra.mxu1 %v2747_v46  ;;  %1373 = vmatpush2.bf16.msra.mxu0 %v2750_v47 }
 0x17b   : > { %1321 = vmatprep.subr.bf16.mxu1 %v2755_v48  ;;  %1374 = vmatprep.subr.bf16.mxu0 %v2758_v49 }
 0x17e   : > { %1322 = vmatpush2.bf16.msra.mxu1 %v2753_v50  ;;  %1375 = vmatpush2.bf16.msra.mxu0 %v2756_v51  ;;  %v2768_v50 = vld [vmem:[#allocation7 + $0x30] sm:$0xff]  }
 0x17f   : > { %1323 = vmatprep.subr.bf16.mxu1 %v2761_v52  ;;  %1376 = vmatprep.subr.bf16.mxu0 %v2764_v53  ;;  %v2769_v53 = vld [vmem:[#allocation7 + $0x68] sm:$0xff]  }
 0x182   : > { %1324 = vmatpush2.bf16.msra.mxu1 %v2759_v54  ;;  %1377 = vmatpush2.bf16.msra.mxu0 %v2762_v55 }
 0x183   : > { %2377 = vmatprep.subr.bf16.mxu1 %v2765_v56 }
 0x204   : > { %v800_v0 = vpop.f32.mrf.mxu1  ;;  %v853_v1 = vpop.f32.mrf.mxu0 }
 0x205   : > { %v801_v14 = vadd.f32 %v800_v0, %v589_v4  ;;  %v854_v15 = vadd.f32 %v853_v1, %v597_v5  ;;  %v2770_v1 = vld [vmem:[#allocation7 + $0x28] sm:$0xff]  }
 0x206   : > { %v802_v6 = vpop.f32.mrf.mxu1  ;;  %v855_v7 = vpop.f32.mrf.mxu0 }
 0x207   : > { %v803_v10 = vadd.f32 %v802_v6, %v593_v2  ;;  %v856_v11 = vadd.f32 %v855_v7, %v601_v3  ;;  %v872_v28 = vmax.f32 %v801_v14, 0.0  ;;  %v874_v29 = vmax.f32 %v854_v15, 0.0  ;;  %v2773_v6 = vld [vmem:[#allocation7 + $0x58] sm:$0xff]   ;;  %v2781_v14 = vld [vmem:[%s3303_s5 + $0x38] sm:$0xff]   ;;  %v2782_v15 = vld [vmem:[%s3303_s5 + $0x30] sm:$0xff]  }
 0x208   : > { %v804_v8 = vpop.f32.mrf.mxu1  ;;  %v857_v9 = vpop.f32.mrf.mxu0  ;;  %v2774_v7 = vld [vmem:[#allocation7 + $0x18] sm:$0xff]   ;;  %2453 = vmatprep.subr.bf16.mxu0 %v2781_v14 }
 0x209   : > { %v805_v12 = vadd.f32 %v804_v8, %v589_v4  ;;  %v858_v13 = vadd.f32 %v857_v9, %v597_v5  ;;  %v873_v24 = vmax.f32 %v803_v10, 0.0  ;;  %v875_v25 = vmax.f32 %v856_v11, 0.0  ;;  %v2775_v8 = vld [vmem:[#allocation7 + $0x50] sm:$0xff]   ;;  %v2777_v10 = vld [vmem:[#allocation7 + $0x48] sm:$0xff]  }
 0x20a   : > { %v806_v16 = vpop.f32.mrf.mxu1  ;;  %v859_v17 = vpop.f32.mrf.mxu0  ;;  %v2776_v9 = vld [vmem:[#allocation7 + $0x10] sm:$0xff]   ;;  %v2778_v11 = vld [vmem:[#allocation7 + $0x8] sm:$0xff]  }
 0x20b   : > { %v807_v18 = vadd.f32 %v806_v16, %v593_v2  ;;  %v860_v19 = vadd.f32 %v859_v17, %v601_v3  ;;  %v876_v20 = vmax.f32 %v805_v12, 0.0  ;;  %v878_v21 = vmax.f32 %v858_v13, 0.0  ;;  %v2779_v12 = vld [vmem:[#allocation7 + $0x40] sm:$0xff]   ;;  %v2783_v16 = vld [vmem:[%s3303_s5 + $0x28] sm:$0xff]  }
 0x20c   : > { %v810_v22 = vpop.f32.mrf.mxu1  ;;  %v863_v23 = vpop.f32.mrf.mxu0  ;;  %v2780_v13 = vld [vmem:[#allocation7] sm:$0xff]   ;;  %v2258_v17 = vld [vmem:[%s3307_s9 + $0x2] ss:$8 sm:$0x3] }
 0x20d   : > { %v877_v26 = vmax.f32 %v807_v18, 0.0  ;;  %v879_v27 = vmax.f32 %v860_v19, 0.0  ;;  %v954_v35 = vpack.c.bf16 %v876_v20, %v872_v28  ;;  %v956_v36 = vpack.c.bf16 %v878_v21, %v874_v29 }
 0x20e   : > { %v812_v30 = vpop.f32.mrf.mxu1  ;;  %v865_v31 = vpop.f32.mrf.mxu0  ;;  %v811_v44 = vadd.f32 %v810_v22, %v589_v4  ;;  %v864_v45 = vadd.f32 %v863_v23, %v597_v5  ;;  %v970_v18 = vrot.slane %v2258_v17, %v592_v59  ;;  %v966_v19 = vrot.slane %v2258_v17, %v588_v61 }
 0x20f   : > { %v955_v32 = vpack.c.bf16 %v877_v26, %v873_v24  ;;  %v957_v33 = vpack.c.bf16 %v879_v27, %v875_v25  ;;  %v813_v37 = vadd.f32 %v812_v30, %v593_v2  ;;  %v866_v41 = vadd.f32 %v865_v31, %v601_v3 }
 0x210   : > { %v814_v38 = vpop.f32.mrf.mxu1  ;;  %v867_v39 = vpop.f32.mrf.mxu0  ;;  %v880_v60 = vmax.f32 %v811_v44, 0.0  ;;  %v882_v62 = vmax.f32 %v864_v45, 0.0 }
 0x211   : > { %v815_v42 = vadd.f32 %v814_v38, %v589_v4  ;;  %v868_v43 = vadd.f32 %v867_v39, %v597_v5  ;;  %1325 = vmatprep.mubr.bf16.mxu1 %v955_v32  ;;  %1378 = vmatprep.mubr.bf16.mxu0 %v957_v33  ;;  %v881_v54 = vmax.f32 %v813_v37, 0.0  ;;  %v883_v55 = vmax.f32 %v866_v41, 0.0 }
 0x212   : > { %v816_v46 = vpop.f32.mrf.mxu1  ;;  %v869_v47 = vpop.f32.mrf.mxu0  ;;  %1326 = vmatmul.mubr.bf16.vlgmr.msra.gmra.mxu1 %v954_v35  ;;  %1379 = vmatmul.mubr.bf16.vlgmr.msra.gmra.mxu0 %v956_v36 }
 0x213   : > { %v817_v48 = vadd.f32 %v816_v46, %v593_v2  ;;  %v870_v49 = vadd.f32 %v869_v47, %v601_v3  ;;  %2378 = vmatpush3.bf16.msra.mxu1 %v2766_v34  ;;  %v884_v51 = vmax.f32 %v815_v42, 0.0  ;;  %v886_v52 = vmax.f32 %v868_v43, 0.0  ;;  %v2771_v2 = vld [vmem:[#allocation7 + $0x60] sm:$0xff]   ;;  %2454 = vmatpush3.bf16.msra.mxu0 %v2781_v14 }
 0x214   : > { %2379 = vmatprep.subr.bf16.mxu1 %v2767_v40  ;;  %v2772_v3 = vld [vmem:[#allocation7 + $0x20] sm:$0xff]   ;;  %2455 = vmatprep.subr.bf16.mxu0 %v2782_v15 }
 0x215   : > { %v885_v56 = vmax.f32 %v817_v48, 0.0  ;;  %v887_v57 = vmax.f32 %v870_v49, 0.0  ;;  %v958_v4 = vpack.c.bf16 %v884_v51, %v880_v60  ;;  %v960_v5 = vpack.c.bf16 %v886_v52, %v882_v62 }
 0x217   : > { %v959_v63 = vpack.c.bf16 %v885_v56, %v881_v54  ;;  %v961_v0 = vpack.c.bf16 %v887_v57, %v883_v55  ;;  %2380 = vmatpush3.bf16.msra.mxu1 %v2768_v50  ;;  %2456 = vmatpush3.bf16.msra.mxu0 %v2782_v15 }
 0x218   : > { %2381 = vmatprep.subr.bf16.mxu1 %v2769_v53  ;;  %2457 = vmatprep.subr.bf16.mxu0 %v2783_v16 }
 0x219   : > { %1335 = vmatprep.mubr.bf16.mxu1 %v959_v63  ;;  %1388 = vmatprep.mubr.bf16.mxu0 %v961_v0  ;;  %v2784_v0 = vld [vmem:[%s3303_s5 + $0x20] sm:$0xff]  }
 0x21a   : > { %1336 = vmatmul.mubr.bf16.gmra.mxu1 %v958_v4  ;;  %1389 = vmatmul.mubr.bf16.gmra.mxu0 %v960_v5  ;;  %v2786_v4 = vld [vmem:[%s3303_s5 + $0x10] sm:$0xff]   ;;  %v2787_v5 = vld [vmem:[%s3303_s5 + $0x8] sm:$0xff]  }
 0x21b   : > { %2382 = vmatpush3.bf16.msra.mxu1 %v2770_v1  ;;  %2458 = vmatpush3.bf16.msra.mxu0 %v2783_v16  ;;  %v2785_v1 = vld [vmem:[%s3303_s5 + $0x18] sm:$0xff]  }
 0x21c   : > { %2383 = vmatprep.subr.bf16.mxu1 %v2771_v2  ;;  %2459 = vmatprep.subr.bf16.mxu0 %v2784_v0  ;;  %v2788_v2 = vld [vmem:[%s3303_s5] sm:$0xff]  }
 0x21f   : > { %2384 = vmatpush3.bf16.msra.mxu1 %v2772_v3  ;;  %2460 = vmatpush3.bf16.msra.mxu0 %v2784_v0  ;;  %v2789_v3 = vld [vmem:[#allocation9 + $0x38] sm:$0xff]  }
 0x220   : > { %2385 = vmatprep.subr.bf16.mxu1 %v2773_v6  ;;  %2461 = vmatprep.subr.bf16.mxu0 %v2785_v1  ;;  %v2790_v6 = vld [vmem:[#allocation9 + $0x30] sm:$0xff]  }
 0x223   : > { %2386 = vmatpush3.bf16.msra.mxu1 %v2774_v7  ;;  %2462 = vmatpush3.bf16.msra.mxu0 %v2785_v1  ;;  %v2791_v7 = vld [vmem:[#allocation9 + $0x28] sm:$0xff]  }
 0x224   : > { %2387 = vmatprep.subr.bf16.mxu1 %v2775_v8  ;;  %2463 = vmatprep.subr.bf16.mxu0 %v2786_v4  ;;  %v2792_v8 = vld [vmem:[#allocation9 + $0x20] sm:$0xff]  }
 0x227   : > { %2388 = vmatpush3.bf16.msra.mxu1 %v2776_v9  ;;  %2464 = vmatpush3.bf16.msra.mxu0 %v2786_v4  ;;  %v2793_v9 = vld [vmem:[#allocation9 + $0x18] sm:$0xff]   ;;  %v1729_v4 = vld [vmem:[%s3307_s9 + $0x5] ss:$0 sm:$0xff] }
 0x228   : > { %2389 = vmatprep.subr.bf16.mxu1 %v2777_v10  ;;  %2465 = vmatprep.subr.bf16.mxu0 %v2787_v5 }
 0x22b   : > { %2390 = vmatpush3.bf16.msra.mxu1 %v2778_v11  ;;  %2466 = vmatpush3.bf16.msra.mxu0 %v2787_v5 }
 0x22c   : > { %2391 = vmatprep.subr.bf16.mxu1 %v2779_v12  ;;  %2467 = vmatprep.subr.bf16.mxu0 %v2788_v2 }
 0x22f   : > { %2392 = vmatpush3.bf16.msra.mxu1 %v2780_v13  ;;  %2468 = vmatpush3.bf16.msra.mxu0 %v2788_v2  ;;  %v1439_v13 = vld [vmem:[%s3307_s9 + $0x3] ss:$0 sm:$0xff] }
 0x230   : > { %2473 = vmatprep.subr.bf16.mxu1 %v2789_v3 }
 0x2d2   : > { %v1327_v20 = vpop.f32.mrf.mxu1  ;;  %v1380_v21 = vpop.f32.mrf.mxu0 }
 0x2d3   : > { %v1328_v25 = vadd.f32 %v1327_v20, %v966_v19 }
 0x2d4   : > { %v1329_v22 = vpop.f32.mrf.mxu1  ;;  %v1382_v23 = vpop.f32.mrf.mxu0 }
 0x2d5   : > { %v1330_v24 = vadd.f32 %v1329_v22, %v970_v18  ;;  %v1381_v34 = vadd.f32 %v1380_v21, %v1328_v25 }
 0x2d6   : > { %v1331_v26 = vpop.f32.mrf.mxu1  ;;  %v1384_v27 = vpop.f32.mrf.mxu0 }
 0x2d7   : > { %v1332_v28 = vadd.f32 %v1331_v26, %v966_v19  ;;  %v1383_v31 = vadd.f32 %v1382_v23, %v1330_v24  ;;  %v1399_v41 = vmax.f32 %v1381_v34, 0.0  ;;  %v2795_v34 = vld [vmem:[#allocation9 + $0x8] sm:$0xff]  }
 0x2d8   : > { %v1333_v29 = vpop.f32.mrf.mxu1  ;;  %v1386_v30 = vpop.f32.mrf.mxu0 }
 0x2d9   : > { %v1385_v32 = vadd.f32 %v1384_v27, %v1332_v28  ;;  %v1334_v33 = vadd.f32 %v1333_v29, %v970_v18  ;;  %v1400_v38 = vmax.f32 %v1383_v31, 0.0 }
 0x2da   : > { %v1337_v35 = vpop.f32.mrf.mxu1  ;;  %v1390_v59 = vpop.f32.mrf.mxu0 }
 0x2db   : > { %v1387_v36 = vadd.f32 %v1386_v30, %v1334_v33  ;;  %v1401_v58 = vmax.f32 %v1385_v32, 0.0  ;;  %v1338_v42 = vadd.f32 %v1337_v35, %v966_v19  ;;  %v2794_v33 = vld [vmem:[#allocation9 + $0x10] sm:$0xff]   ;;  %v2796_v35 = vld [vmem:[#allocation9] sm:$0xff]  }
 0x2dc   : > { %v1339_v61 = vpop.f32.mrf.mxu1  ;;  %v1392_v37 = vpop.f32.mrf.mxu0 }
 0x2dd   : > { %v1402_v39 = vmax.f32 %v1387_v36, 0.0  ;;  %v1340_v40 = vadd.f32 %v1339_v61, %v970_v18  ;;  %v1440_v47 = vpack.c.bf16 %v1401_v58, %v1399_v41  ;;  %v1391_v52 = vadd.f32 %v1390_v59, %v1338_v42  ;;  %v2797_v59 = vld [vmem:[#allocation10 + $0x38] sm:$0xff]   ;;  %v2798_v36 = vld [vmem:[#allocation10 + $0x30] sm:$0xff]   ;;  %v2799_v58 = vld [vmem:[#allocation10 + $0x28] sm:$0xff]  }
 0x2de   : > { %v1341_v43 = vpop.f32.mrf.mxu1  ;;  %v1394_v44 = vpop.f32.mrf.mxu0  ;;  %2493 = vmatprep.subr.bf16.mxu0 %v2797_v59  ;;  %v2800_v61 = vld [vmem:[#allocation10 + $0x20] sm:$0xff]  }
 0x2df   : > { %v1441_v45 = vpack.c.bf16 %v1402_v39, %v1400_v38  ;;  %v1342_v46 = vadd.f32 %v1341_v43, %v966_v19  ;;  %v1393_v49 = vadd.f32 %v1392_v37, %v1340_v40  ;;  %v1403_v60 = vmax.f32 %v1391_v52, 0.0  ;;  %v2801_v37 = vld [vmem:[#allocation10 + $0x18] sm:$0xff]   ;;  %v1609_v40 = vld [vmem:[%s3307_s9 + $0x4] ss:$0 sm:$0xff] }
 0x2e0   : > { %v1343_v48 = vpop.f32.mrf.mxu1  ;;  %v1396_v53 = vpop.f32.mrf.mxu0 }
 0x2e1   : > { %v1395_v50 = vadd.f32 %v1394_v44, %v1342_v46  ;;  %v1344_v51 = vadd.f32 %v1343_v48, %v970_v18  ;;  %1572 = vmatprep.mubr.bf16.mxu1 %v1441_v45  ;;  %v1404_v56 = vmax.f32 %v1393_v49, 0.0 }
 0x2e2   : > { %1573 = vmatmul.mubr.bf16.vlgmr.msra.gmra.mxu1 %v1440_v47 }
 0x2e3   : > { %v1397_v54 = vadd.f32 %v1396_v53, %v1344_v51  ;;  %v1405_v55 = vmax.f32 %v1395_v50, 0.0  ;;  %2474 = vmatpush3.bf16.msra.mxu1 %v2789_v3  ;;  %v2802_v53 = vld [vmem:[#allocation10 + $0x10] sm:$0xff]  }
 0x2e4   : > { %2475 = vmatprep.subr.bf16.mxu1 %v2790_v6 }
 0x2e5   : > { %v1406_v57 = vmax.f32 %v1397_v54, 0.0  ;;  %v1442_v63 = vpack.c.bf16 %v1405_v55, %v1403_v60  ;;  %v2803_v54 = vld [vmem:[#allocation10 + $0x8] sm:$0xff]   ;;  %v2804_v55 = vld [vmem:[#allocation10] sm:$0xff]  }
 0x2e6   : > { %v2807_v60 = vld [vmem:[#allocation12 + $0x28] sm:$0xff]  }
 0x2e7   : > { %v1443_v62 = vpack.c.bf16 %v1406_v57, %v1404_v56  ;;  %2476 = vmatpush3.bf16.msra.mxu1 %v2790_v6  ;;  %v2805_v56 = vld [vmem:[#allocation12 + $0x38] sm:$0xff]   ;;  %v2806_v57 = vld [vmem:[#allocation12 + $0x30] sm:$0xff]  }
 0x2e8   : > { %2477 = vmatprep.subr.bf16.mxu1 %v2791_v7 }
 0x2e9   : > { %1580 = vmatprep.mubr.bf16.mxu1 %v1443_v62  ;;  %v2808_v62 = vld [vmem:[#allocation12 + $0x20] sm:$0xff]  }
 0x2ea   : > { %1581 = vmatmul.mubr.bf16.gmra.mxu1 %v1442_v63  ;;  %v2809_v63 = vld [vmem:[#allocation12 + $0x18] sm:$0xff]  }
 0x2eb   : > { %2478 = vmatpush3.bf16.msra.mxu1 %v2791_v7 }
 0x2ec   : > { %2479 = vmatprep.subr.bf16.mxu1 %v2792_v8 }
 0x2ef   : > { %2480 = vmatpush3.bf16.msra.mxu1 %v2792_v8 }
 0x2f0   : > { %2481 = vmatprep.subr.bf16.mxu1 %v2793_v9 }
 0x2f3   : > { %2482 = vmatpush3.bf16.msra.mxu1 %v2793_v9 }
 0x2f4   : > { %2483 = vmatprep.subr.bf16.mxu1 %v2794_v33 }
 0x2f7   : > { %2484 = vmatpush3.bf16.msra.mxu1 %v2794_v33 }
 0x2f8   : > { %2485 = vmatprep.subr.bf16.mxu1 %v2795_v34 }
 0x2fb   : > { %2486 = vmatpush3.bf16.msra.mxu1 %v2795_v34  ;;  %v1969_v34 = vld [vmem:[%s3307_s9 + $0x7] ss:$0 sm:$0xff] }
 0x2fc   : > { %2487 = vmatprep.subr.bf16.mxu1 %v2796_v35 }
 0x2ff   : > { %2488 = vmatpush3.bf16.msra.mxu1 %v2796_v35 }
 0x300   : > { %2513 = vmatprep.subr.bf16.mxu1 %v2805_v56 }
 0x3a2   : > { %v2393_v10 = vpop.f32.mrf.mxu1 }
 0x3a4   : > { %v2394_v11 = vpop.f32.mrf.mxu1 }
 0x3a5   : > { %v2395_v12 = vadd.f32 %v2394_v11, %v2393_v10 }
 0x3a6   : > { %v2396_v14 = vpop.f32.mrf.mxu1 }
 0x3a7   : > { %v1575_v16 = vadd.f32 %v2395_v12, %v1439_v13 }
 0x3a8   : > { %v2397_v15 = vpop.f32.mrf.mxu1 }
 0x3a9   : > { %v2398_v17 = vadd.f32 %v2397_v15, %v2396_v14  ;;  %v1589_v21 = vmax.f32 %v1575_v16, 0.0  ;;  %v2810_v15 = vld [vmem:[#allocation12 + $0x10] sm:$0xff]   ;;  %v2811_v16 = vld [vmem:[#allocation12 + $0x8] sm:$0xff]  }
 0x3aa   : > { %v2399_v18 = vpop.f32.mrf.mxu1 }
 0x3ab   : > { %v1578_v19 = vadd.f32 %v2398_v17, %v1439_v13  ;;  %v2812_v17 = vld [vmem:[#allocation12] sm:$0xff]  }
 0x3ac   : > { %v2400_v20 = vpop.f32.mrf.mxu1 }
 0x3ad   : > { %v1590_v22 = vmax.f32 %v1578_v19, 0.0  ;;  %v2401_v23 = vadd.f32 %v2400_v20, %v2399_v18  ;;  %v1849_v20 = vld [vmem:[%s3307_s9 + $0x6] ss:$0 sm:$0xff] }
 0x3ae   : > { %v2402_v24 = vpop.f32.mrf.mxu1 }
 0x3af   : > { %v1610_v25 = vpack.c.bf16 %v1590_v22, %v1589_v21  ;;  %v1583_v27 = vadd.f32 %v2401_v23, %v1439_v13 }
 0x3b0   : > { %v2403_v26 = vpop.f32.mrf.mxu1 }
 0x3b1   : > { %v2404_v28 = vadd.f32 %v2403_v26, %v2402_v24  ;;  %2469 = vmatprep.mubr.bf16.mxu0 %v1610_v25  ;;  %v1591_v30 = vmax.f32 %v1583_v27, 0.0 }
 0x3b3   : > { %v1586_v29 = vadd.f32 %v2404_v28, %v1439_v13 }
 0x3b5   : > { %v1592_v31 = vmax.f32 %v1586_v29, 0.0 }
 0x3b7   : > { %v1611_v32 = vpack.c.bf16 %v1592_v31, %v1591_v30 }
 0x3b9   : > { %2470 = vmatmul.mubr.bf16.vlgmr.msra.gmra.mxu0 %v1611_v32 }
 0x3ba   : > { %2494 = vmatpush3.bf16.msra.mxu0 %v2797_v59 }
 0x3bb   : > { %2495 = vmatprep.subr.bf16.mxu0 %v2798_v36 }
 0x3be   : > { %2496 = vmatpush3.bf16.msra.mxu0 %v2798_v36 }
 0x3bf   : > { %2497 = vmatprep.subr.bf16.mxu0 %v2799_v58 }
 0x3c2   : > { %2498 = vmatpush3.bf16.msra.mxu0 %v2799_v58 }
 0x3c3   : > { %2499 = vmatprep.subr.bf16.mxu0 %v2800_v61 }
 0x3c6   : > { %2500 = vmatpush3.bf16.msra.mxu0 %v2800_v61 }
 0x3c7   : > { %2501 = vmatprep.subr.bf16.mxu0 %v2801_v37 }
 0x3ca   : > { %2502 = vmatpush3.bf16.msra.mxu0 %v2801_v37 }
 0x3cb   : > { %2503 = vmatprep.subr.bf16.mxu0 %v2802_v53 }
 0x3ce   : > { %2504 = vmatpush3.bf16.msra.mxu0 %v2802_v53 }
 0x3cf   : > { %2505 = vmatprep.subr.bf16.mxu0 %v2803_v54 }
 0x3d2   : > { %2506 = vmatpush3.bf16.msra.mxu0 %v2803_v54 }
 0x3d3   : > { %2507 = vmatprep.subr.bf16.mxu0 %v2804_v55 }
 0x3d6   : > { %2508 = vmatpush3.bf16.msra.mxu0 %v2804_v55 }
 0x479   : > { %v2471_v38 = vpop.f32.mrf.mxu0 }
 0x47a   : > { %v1703_v44 = vadd.f32 %v2471_v38, %v1609_v40 }
 0x47b   : > { %v1694_v39 = vpop.f32.mrf.mxu0 }
 0x47c   : > { %v1695_v42 = vadd.f32 %v1694_v39, %v1609_v40  ;;  %v1711_v50 = vmax.f32 %v1703_v44, 0.0 }
 0x47d   : > { %v2472_v41 = vpop.f32.mrf.mxu0 }
 0x47e   : > { %v1706_v43 = vadd.f32 %v2472_v41, %v1609_v40  ;;  %v1709_v48 = vmax.f32 %v1695_v42, 0.0 }
 0x47f   : > { %v1697_v45 = vpop.f32.mrf.mxu0 }
 0x480   : > { %v1698_v46 = vadd.f32 %v1697_v45, %v1609_v40  ;;  %v1712_v47 = vmax.f32 %v1706_v43, 0.0 }
 0x482   : > { %v1710_v49 = vmax.f32 %v1698_v46, 0.0  ;;  %v1731_v52 = vpack.c.bf16 %v1712_v47, %v1711_v50 }
 0x484   : > { %v1730_v51 = vpack.c.bf16 %v1710_v49, %v1709_v48 }
 0x486   : > { %2489 = vmatprep.mubr.bf16.mxu1 %v1730_v51 }
 0x487   : > { %2490 = vmatmul.mubr.bf16.vlgmr.msra.gmra.mxu1 %v1731_v52 }
 0x488   : > { %2514 = vmatpush3.bf16.msra.mxu1 %v2805_v56 }
 0x489   : > { %2515 = vmatprep.subr.bf16.mxu1 %v2806_v57 }
 0x48c   : > { %2516 = vmatpush3.bf16.msra.mxu1 %v2806_v57 }
 0x48d   : > { %2517 = vmatprep.subr.bf16.mxu1 %v2807_v60 }
 0x490   : > { %2518 = vmatpush3.bf16.msra.mxu1 %v2807_v60 }
 0x491   : > { %2519 = vmatprep.subr.bf16.mxu1 %v2808_v62 }
 0x494   : > { %2520 = vmatpush3.bf16.msra.mxu1 %v2808_v62 }
 0x495   : > { %2521 = vmatprep.subr.bf16.mxu1 %v2809_v63 }
 0x498   : > { %2522 = vmatpush3.bf16.msra.mxu1 %v2809_v63 }
 0x499   : > { %2523 = vmatprep.subr.bf16.mxu1 %v2810_v15 }
 0x49c   : > { %2524 = vmatpush3.bf16.msra.mxu1 %v2810_v15 }
 0x49d   : > { %2525 = vmatprep.subr.bf16.mxu1 %v2811_v16 }
 0x4a0   : > { %2526 = vmatpush3.bf16.msra.mxu1 %v2811_v16 }
 0x4a1   : > { %2527 = vmatprep.subr.bf16.mxu1 %v2812_v17 }
 0x4a4   : > { %2528 = vmatpush3.bf16.msra.mxu1 %v2812_v17 }
 0x547   : > { %v2491_v0 = vpop.f32.mrf.mxu1 }
 0x548   : > { %v1823_v6 = vadd.f32 %v2491_v0, %v1729_v4 }
 0x549   : > { %v1814_v1 = vpop.f32.mrf.mxu1 }
 0x54a   : > { %v1815_v2 = vadd.f32 %v1814_v1, %v1729_v4  ;;  %v1831_v12 = vmax.f32 %v1823_v6, 0.0 }
 0x54b   : > { %v2492_v5 = vpop.f32.mrf.mxu1 }
 0x54c   : > { %v1826_v3 = vadd.f32 %v2492_v5, %v1729_v4  ;;  %v1829_v10 = vmax.f32 %v1815_v2, 0.0 }
 0x54d   : > { %v1817_v7 = vpop.f32.mrf.mxu1 }
 0x54e   : > { %v1818_v8 = vadd.f32 %v1817_v7, %v1729_v4  ;;  %v1832_v9 = vmax.f32 %v1826_v3, 0.0 }
 0x550   : > { %v1830_v11 = vmax.f32 %v1818_v8, 0.0  ;;  %v1851_v14 = vpack.c.bf16 %v1832_v9, %v1831_v12 }
 0x552   : > { %v1850_v13 = vpack.c.bf16 %v1830_v11, %v1829_v10 }
 0x554   : > { %2509 = vmatprep.mubr.bf16.mxu0 %v1850_v13 }
 0x555   : > { %2510 = vmatmul.mubr.bf16.vlgmr.msra.gmra.mxu0 %v1851_v14 }
 0x615   : > { %v2511_v18 = vpop.f32.mrf.mxu0 }
 0x616   : > { %v1943_v24 = vadd.f32 %v2511_v18, %v1849_v20 }
 0x617   : > { %v1934_v19 = vpop.f32.mrf.mxu0 }
 0x618   : > { %v1935_v22 = vadd.f32 %v1934_v19, %v1849_v20  ;;  %v1951_v30 = vmax.f32 %v1943_v24, 0.0 }
 0x619   : > { %v2512_v21 = vpop.f32.mrf.mxu0 }
 0x61a   : > { %v1946_v23 = vadd.f32 %v2512_v21, %v1849_v20  ;;  %v1949_v28 = vmax.f32 %v1935_v22, 0.0 }
 0x61b   : > { %v1937_v25 = vpop.f32.mrf.mxu0 }
 0x61c   : > { %v1938_v26 = vadd.f32 %v1937_v25, %v1849_v20  ;;  %v1952_v27 = vmax.f32 %v1946_v23, 0.0 }
 0x61e   : > { %v1950_v29 = vmax.f32 %v1938_v26, 0.0  ;;  %v1971_v32 = vpack.c.bf16 %v1952_v27, %v1951_v30 }
 0x620   : > { %v1970_v31 = vpack.c.bf16 %v1950_v29, %v1949_v28 }
 0x622   : > { %2529 = vmatprep.mubr.bf16.mxu1 %v1970_v31 }
 0x623   : > { %2530 = vmatmul.mubr.bf16.vlgmr.msra.gmra.mxu1 %v1971_v32 }
 0x6e3   : > { %v2531_v33 = vpop.f32.mrf.mxu1 }
 0x6e4   : > { %v2063_v37 = vadd.f32 %v2531_v33, %v1969_v34 }
 0x6e5   : > { %v2054_v35 = vpop.f32.mrf.mxu1 }
 0x6e6   : > { %v2055_v59 = vadd.f32 %v2054_v35, %v1969_v34  ;;  %2071 = vst [vmem:[%s463_s11 + $0x10] sm:$0xff] %v2063_v37 }
 0x6e7   : > { %v2532_v36 = vpop.f32.mrf.mxu1 }
 0x6e8   : > { %2069 = vst [vmem:[%s463_s11] sm:$0xff] %v2055_v59  ;;  %v2066_v38 = vadd.f32 %v2532_v36, %v1969_v34 }
 0x6e9   : > { %v2057_v58 = vpop.f32.mrf.mxu1 }
 0x6ea   : > { %v2058_v61 = vadd.f32 %v2057_v58, %v1969_v34  ;;  %2072 = vst [vmem:[%s463_s11 + $0x18] sm:$0xff] %v2066_v38 }
 0x6ec   : > { %2070 = vst [vmem:[%s463_s11 + $0x8] sm:$0xff] %v2058_v61 }
 0x6ed PF: > { %s24_s13 = sadd.s32 1, %s3017_s13  }
 0x6ee   : > { %p21_p2 = scmp.ge.s32.totalorder %s24_s13, 4  }
 0x6f0   :  { %23 = sbr.rel (!%p21_p2) target bundleno = 4 (0x4), region = 121 }
 0x6f5   :  { %2095 = vsyncpa [#allocation3], 1 }
 0x6f6   :  { %2097 = vsyncpa [#allocation3 + $0x1], 1 }
 0x6f7   :  { %2098 = vsyncpa [#allocation5], 1 }
 0x6f8   :  { %2099 = vsyncpa [#allocation8], 1 }
 0x6f9   :  { %2100 = vsyncpa [#allocation11], 1 }

</bundles_post_ra>
